<compile_context>
chip_gen: v5e
topology: v5e:2x2
jax: 0.10.0
libtpu: 0.0.40
codegen_flags: <defaults>
</compile_context>

<pallas_src>
import jax
import jax.numpy as jnp
from jax.experimental import pallas as pl
from jax.experimental.pallas import tpu as pltpu

LEAKY_SLOPE = 0.01          # F.leaky_relu default negative_slope
_MEGACORE_MIN_SPLIT = 512   # only split batch across >=2 grid steps if each tile >= this


def _leaky_relu(x):
    # slope in (0,1) => max(x, slope*x) == where(x > 0, x, slope*x) exactly.
    return jnp.maximum(x, LEAKY_SLOPE * x)


def _round_up(n, m):
    return ((n + m - 1) // m) * m


def _choose_tile(B, block_b):
    """Pick the batch tile TB and grid length nb."""
    if B >= 2 * _MEGACORE_MIN_SPLIT:
        # Large batch: at least 2 grid steps so v7x megacore can shard the batch axis.
        nb_target = max(2, pl.cdiv(B, block_b))
        TB = _round_up(pl.cdiv(B, nb_target), 8)
    else:
        # Small batch: one (or few) big tiles; step overhead dominates tiny tiles.
        TB = _round_up(min(max(B, 1), block_b), 8)
    nb = pl.cdiv(B, TB)
    return TB, nb


def make_critic_kernel(action_is_scalar: bool):
    """Kernel factory; `action_is_scalar` is a static Python bool (action_space == 1)."""

    def critic_kernel(s_ref, a_ref, ws_ref, wa_ref, bsa_ref,
                      w1_ref, b1_ref, w2_ref, b2_ref, out_ref):
        # ---- Layer 0: fused FC_state | FC_action (block-diagonal, split in two) ----
        sa = jnp.dot(s_ref[...], ws_ref[...], preferred_element_type=jnp.float32)
        if action_is_scalar:
            # action is a single column: the "dot" is a VPU broadcast mul-add.
            sa = sa + a_ref[...].astype(jnp.float32) * wa_ref[...].astype(jnp.float32)
        else:
            sa = sa + jnp.dot(a_ref[...], wa_ref[...], preferred_element_type=jnp.float32)
        sa = _leaky_relu(sa + bsa_ref[...])                      # f32 (v5e-safe)

        # ---- Layer 1: FC_layer_1 -> [TB, 64] ----
        h = jnp.dot(sa.astype(w1_ref.dtype), w1_ref[...],
                    preferred_element_type=jnp.float32)
        h = _leaky_relu(h + b1_ref[...])

        # ---- Layer 2: FC_layer_2 -> [TB, action_space] (no lane padding) ----
        q = jnp.dot(h.astype(w2_ref.dtype), w2_ref[...],
                    preferred_element_type=jnp.float32)
        out_ref[...] = (q + b2_ref[...]).astype(out_ref.dtype)

    return critic_kernel


def pack_params(params, compute_dtype=jnp.float32):
    """One-time parameter packing (call once, outside the per-step hot path).

    Produces the zero-extended layer-0 weights so the kernel never concatenates:
      ws_ext = [ws | 0]  (S, 64),  wa_ext = [0 | wa]  (A, 64),  b_sa = [bs | ba] (1, 64)
    Matmul weights are cast to compute_dtype; biases stay f32 (bias add / leaky_relu
    run on the f32 VPU path).
    """
    S, n32 = params["ws"].shape
    A, m32 = params["wa"].shape
    H0 = n32 + m32
    ws_ext = jnp.zeros((S, H0), jnp.float32).at[:, :n32].set(params["ws"])
    wa_ext = jnp.zeros((A, H0), jnp.float32).at[:, n32:].set(params["wa"])
    b_sa = jnp.concatenate([params["bs"], params["ba"]], axis=-1)        # [1, 64] f32
    return dict(
        ws=ws_ext.astype(compute_dtype),
        wa=wa_ext.astype(compute_dtype),
        bsa=b_sa,
        w1=params["w1"].astype(compute_dtype),
        b1=params["b1"],
        w2=params["w2"].astype(compute_dtype),
        b2=params["b2"],
    )


def critic_forward(state, action, packed, *, block_b=2048):
    """Fused critic forward.

    state:  [B, state_space]   action: [B, action_space]
    packed: output of pack_params().
    block_b: batch tile upper bound (2048 rows of streamed data is a few KiB/row;
             intermediates ~1 MiB — comfortably under v7x's 64 MiB VMEM).
    """
    B, S = state.shape
    A = action.shape[1]
    H0 = packed["ws"].shape[1]          # 64
    H1 = packed["w1"].shape[1]          # 64
    AS = packed["w2"].shape[1]          # action_space
    cdt = packed["ws"].dtype            # compute/streaming dtype (f32 default)

    state = state.astype(cdt)           # no-op for the default f32 path
    action = action.astype(cdt)

    TB, nb = _choose_tile(B, block_b)

    grid_spec = pltpu.PrefetchScalarGridSpec(
        num_scalar_prefetch=0,
        grid=(nb,),
        in_specs=[
            pl.BlockSpec((TB, S), lambda i: (i, 0)),       # streamed state tile
            pl.BlockSpec((TB, A), lambda i: (i, 0)),       # streamed action tile
            pl.BlockSpec((S, H0), lambda i: (0, 0)),       # VMEM-resident params
            pl.BlockSpec((A, H0), lambda i: (0, 0)),
            pl.BlockSpec((1, H0), lambda i: (0, 0)),
            pl.BlockSpec((H0, H1), lambda i: (0, 0)),
            pl.BlockSpec((1, H1), lambda i: (0, 0)),
            pl.BlockSpec((H1, AS), lambda i: (0, 0)),
            pl.BlockSpec((1, AS), lambda i: (0, 0)),
        ],
        out_specs=pl.BlockSpec((TB, AS), lambda i: (i, 0)),   # write-minimal output
    )

    return pl.pallas_call(
        make_critic_kernel(A == 1),
        out_shape=jax.ShapeDtypeStruct((B, AS), jnp.float32),
        grid_spec=grid_spec,
        compiler_params=pltpu.CompilerParams(
            dimension_semantics=("parallel",),   # shards batch tiles across v7x TCs
        ),
    )(state, action, packed["ws"], packed["wa"], packed["bsa"],
      packed["w1"], packed["b1"], packed["w2"], packed["b2"])


def init_params(key, state_space, action_space):
    """Deterministic synthetic init (PyTorch-Linear-like uniform fan-in bounds).
    Weights stored as [in, out] (transposed relative to nn.Linear.weight)."""
    def linear(key, fan_in, fan_out):
        kw, kb = jax.random.split(key)
        bound = 1.0 / jnp.sqrt(fan_in)
        w = jax.random.uniform(kw, (fan_in, fan_out), jnp.float32, -bound, bound)
        b = jax.random.uniform(kb, (1, fan_out), jnp.float32, -bound, bound)
        return w, b

    k1, k2, k3, k4 = jax.random.split(key, 4)
    ws, bs = linear(k1, state_space, 32)    # FC_state
    wa, ba = linear(k2, action_space, 32)   # FC_action
    w1, b1 = linear(k3, 64, 64)             # FC_layer_1
    w2, b2 = linear(k4, 64, action_space)   # FC_layer_2
    return dict(ws=ws, bs=bs, wa=wa, ba=ba, w1=w1, b1=b1, w2=w2, b2=b2)


def critic_reference(state, action, p):
    """Pure-JAX reference matching the PyTorch forward exactly (f32)."""
    x = jax.nn.leaky_relu(state @ p["ws"] + p["bs"], LEAKY_SLOPE)
    y = jax.nn.leaky_relu(action @ p["wa"] + p["ba"], LEAKY_SLOPE)
    sa = jnp.concatenate([x, y], axis=-1)
    h = jax.nn.leaky_relu(sa @ p["w1"] + p["b1"], LEAKY_SLOPE)
    return h @ p["w2"] + p["b2"]


if __name__ == "__main__":
    # Physical pendulum: state_space=3 (cos, sin, thetadot), action_space=1 (torque)
    B, STATE_SPACE, ACTION_SPACE = 2, 3, 1

    key = jax.random.PRNGKey(0)
    k_s, k_a, k_p = jax.random.split(key, 3)
    state = jax.random.normal(k_s, (B, STATE_SPACE), jnp.float32)
    action = jax.random.normal(k_a, (B, ACTION_SPACE), jnp.float32)
    params = init_params(k_p, STATE_SPACE, ACTION_SPACE)
    packed_f32 = pack_params(params)                       # one-time packing

    q_ref = critic_reference(state, action, params)

    # f32 path, tiny batch (single partial tile) — tight check
    q = jax.block_until_ready(critic_forward(state, action, packed_f32))
    assert q.shape == (B, ACTION_SPACE)
    assert jnp.allclose(q, q_ref, atol=1e-5, rtol=1e-5), (q, q_ref)

    # multi-tile grid with a partial last block: B=40, block_b=16 -> grid=(3,)
    B2 = 40
    k_s2, k_a2 = jax.random.split(jax.random.PRNGKey(1))
    state2 = jax.random.normal(k_s2, (B2, STATE_SPACE), jnp.float32)
    action2 = jax.random.normal(k_a2, (B2, ACTION_SPACE), jnp.float32)
    q2 = jax.block_until_ready(critic_forward(state2, action2, packed_f32, block_b=16))
    q2_ref = critic_reference(state2, action2, params)
    assert q2.shape == (B2, ACTION_SPACE)
    assert jnp.allclose(q2, q2_ref, atol=1e-5, rtol=1e-5), (q2, q2_ref)

    # larger batch exercising the >=2-grid-step (v7x megacore) split with a partial tile
    B3 = 1250
    k_s3, k_a3 = jax.random.split(jax.random.PRNGKey(2))
    state3 = jax.random.normal(k_s3, (B3, STATE_SPACE), jnp.float32)
    action3 = jax.random.normal(k_a3, (B3, ACTION_SPACE), jnp.float32)
    q3 = jax.block_until_ready(critic_forward(state3, action3, packed_f32))
    q3_ref = critic_reference(state3, action3, params)
    assert q3.shape == (B3, ACTION_SPACE)
    assert jnp.allclose(q3, q3_ref, atol=1e-4, rtol=1e-4), (q3, q3_ref)

    # bf16 streaming path (opt-in knob for v6e/v7x; keep f32 default on v5e) — loose check
    packed_bf16 = pack_params(params, compute_dtype=jnp.bfloat16)
    q_bf16 = jax.block_until_ready(critic_forward(state, action, packed_bf16))
    assert q_bf16.shape == (B, ACTION_SPACE)
    assert jnp.allclose(q_bf16, q_ref, atol=5e-2, rtol=5e-2), (q_bf16, q_ref)

    print("KERNEL_OK")
</pallas_src>

<mosaic_0001>
module attributes {stable_mosaic.version = 11 : i64} {
  func.func @critic_kernel(%arg0: i32, %arg1: memref<8x3xf32, #tpu.memory_space<vmem>>, %arg2: memref<8x1xf32, #tpu.memory_space<vmem>>, %arg3: memref<3x64xf32, #tpu.memory_space<vmem>>, %arg4: memref<1x64xf32, #tpu.memory_space<vmem>>, %arg5: memref<1x64xf32, #tpu.memory_space<vmem>>, %arg6: memref<64x64xf32, #tpu.memory_space<vmem>>, %arg7: memref<1x64xf32, #tpu.memory_space<vmem>>, %arg8: memref<64x1xf32, #tpu.memory_space<vmem>>, %arg9: memref<1x1xf32, #tpu.memory_space<vmem>>, %arg10: memref<8x1xf32, #tpu.memory_space<vmem>>) attributes {dimension_semantics = [#tpu.dimension_semantics<parallel>], iteration_bounds = array<i64: 1>, scalar_prefetch = 0 : i64, scratch_operands = 0 : i64, tpu.core_type = #tpu.core_type<tc>, window_params = [{transform_indices = @transform_0, window_bounds = array<i64: 8, 3>}, {transform_indices = @transform_1, window_bounds = array<i64: 8, 1>}, {pipeline_mode = #tpu.pipeline_mode<synchronous>, transform_indices = @transform_2, window_bounds = array<i64: 3, 64>}, {pipeline_mode = #tpu.pipeline_mode<synchronous>, transform_indices = @transform_3, window_bounds = array<i64: 1, 64>}, {pipeline_mode = #tpu.pipeline_mode<synchronous>, transform_indices = @transform_4, window_bounds = array<i64: 1, 64>}, {pipeline_mode = #tpu.pipeline_mode<synchronous>, transform_indices = @transform_5, window_bounds = array<i64: 64, 64>}, {pipeline_mode = #tpu.pipeline_mode<synchronous>, transform_indices = @transform_6, window_bounds = array<i64: 1, 64>}, {pipeline_mode = #tpu.pipeline_mode<synchronous>, transform_indices = @transform_7, window_bounds = array<i64: 64, 1>}, {pipeline_mode = #tpu.pipeline_mode<synchronous>, transform_indices = @transform_8, window_bounds = array<i64: 1, 1>}, {transform_indices = @transform_9, window_bounds = array<i64: 8, 1>}]} {
    %c0 = arith.constant 0 : index
    %c0_0 = arith.constant 0 : index
    %0 = vector.load %arg1[%c0, %c0_0] : memref<8x3xf32, #tpu.memory_space<vmem>>, vector<8x3xf32>
    %c0_1 = arith.constant 0 : index
    %c0_2 = arith.constant 0 : index
    %1 = vector.load %arg3[%c0_1, %c0_2] : memref<3x64xf32, #tpu.memory_space<vmem>>, vector<3x64xf32>
    %cst = arith.constant dense<0.000000e+00> : vector<8x64xf32>
    %2 = tpu.matmul %0, %1, %cst {dimension_numbers = #tpu.dot_dimension_numbers<[1], [0], [0], [1], [0, 0, 1, 1], [], []>} : vector<8x3xf32>, vector<3x64xf32>, vector<8x64xf32> -> vector<8x64xf32>
    %c0_3 = arith.constant 0 : index
    %c0_4 = arith.constant 0 : index
    %3 = vector.load %arg2[%c0_3, %c0_4] : memref<8x1xf32, #tpu.memory_space<vmem>>, vector<8x1xf32>
    %c0_5 = arith.constant 0 : index
    %c0_6 = arith.constant 0 : index
    %4 = vector.load %arg4[%c0_5, %c0_6] : memref<1x64xf32, #tpu.memory_space<vmem>>, vector<1x64xf32>
    %5 = vector.broadcast %3 : vector<8x1xf32> to vector<8x64xf32>
    %6 = vector.broadcast %4 : vector<1x64xf32> to vector<8x64xf32>
    %7 = arith.mulf %5, %6 : vector<8x64xf32>
    %8 = arith.addf %2, %7 : vector<8x64xf32>
    %c0_7 = arith.constant 0 : index
    %c0_8 = arith.constant 0 : index
    %9 = vector.load %arg5[%c0_7, %c0_8] : memref<1x64xf32, #tpu.memory_space<vmem>>, vector<1x64xf32>
    %10 = vector.broadcast %9 : vector<1x64xf32> to vector<8x64xf32>
    %11 = arith.addf %8, %10 : vector<8x64xf32>
    %cst_9 = arith.constant 0.00999999977 : f32
    %12 = vector.broadcast %cst_9 : f32 to vector<8x64xf32>
    %13 = arith.mulf %12, %11 : vector<8x64xf32>
    %14 = arith.maximumf %11, %13 : vector<8x64xf32>
    %c0_10 = arith.constant 0 : index
    %c0_11 = arith.constant 0 : index
    %15 = vector.load %arg6[%c0_10, %c0_11] : memref<64x64xf32, #tpu.memory_space<vmem>>, vector<64x64xf32>
    %cst_12 = arith.constant dense<0.000000e+00> : vector<8x64xf32>
    %16 = tpu.matmul %14, %15, %cst_12 {dimension_numbers = #tpu.dot_dimension_numbers<[1], [0], [0], [1], [0, 0, 1, 1], [], []>} : vector<8x64xf32>, vector<64x64xf32>, vector<8x64xf32> -> vector<8x64xf32>
    %c0_13 = arith.constant 0 : index
    %c0_14 = arith.constant 0 : index
    %17 = vector.load %arg7[%c0_13, %c0_14] : memref<1x64xf32, #tpu.memory_space<vmem>>, vector<1x64xf32>
    %18 = vector.broadcast %17 : vector<1x64xf32> to vector<8x64xf32>
    %19 = arith.addf %16, %18 : vector<8x64xf32>
    %cst_15 = arith.constant 0.00999999977 : f32
    %20 = vector.broadcast %cst_15 : f32 to vector<8x64xf32>
    %21 = arith.mulf %20, %19 : vector<8x64xf32>
    %22 = arith.maximumf %19, %21 : vector<8x64xf32>
    %c0_16 = arith.constant 0 : index
    %c0_17 = arith.constant 0 : index
    %23 = vector.load %arg8[%c0_16, %c0_17] : memref<64x1xf32, #tpu.memory_space<vmem>>, vector<64x1xf32>
    %cst_18 = arith.constant dense<0.000000e+00> : vector<8x1xf32>
    %24 = tpu.matmul %22, %23, %cst_18 {dimension_numbers = #tpu.dot_dimension_numbers<[1], [0], [0], [1], [0, 0, 1, 1], [], []>} : vector<8x64xf32>, vector<64x1xf32>, vector<8x1xf32> -> vector<8x1xf32>
    %c0_19 = arith.constant 0 : index
    %c0_20 = arith.constant 0 : index
    %25 = vector.load %arg9[%c0_19, %c0_20] : memref<1x1xf32, #tpu.memory_space<vmem>>, vector<1x1xf32>
    %26 = vector.broadcast %25 : vector<1x1xf32> to vector<8x1xf32>
    %27 = arith.addf %24, %26 : vector<8x1xf32>
    %c0_21 = arith.constant 0 : index
    %c0_22 = arith.constant 0 : index
    %28 = vector.load %arg10[%c0_21, %c0_22] : memref<8x1xf32, #tpu.memory_space<vmem>>, vector<8x1xf32>
    tpu.vector_store %arg10[%c0_21, %c0_22], %27 {strides = array<i32>} : memref<8x1xf32, #tpu.memory_space<vmem>>, vector<8x1xf32>,
    return
  }
  func.func @transform_0(%arg0: i32) -> (i32, i32) {
    %c0_i32 = arith.constant 0 : i32
    %c0_i32_0 = arith.constant 0 : i32
    return %arg0, %c0_i32 : i32, i32
  }
  func.func @transform_1(%arg0: i32) -> (i32, i32) {
    %c0_i32 = arith.constant 0 : i32
    %c0_i32_0 = arith.constant 0 : i32
    return %arg0, %c0_i32 : i32, i32
  }
  func.func @transform_2(%arg0: i32) -> (i32, i32) {
    %c0_i32 = arith.constant 0 : i32
    %c0_i32_0 = arith.constant 0 : i32
    %c0_i32_1 = arith.constant 0 : i32
    return %c0_i32, %c0_i32_0 : i32, i32
  }
  func.func @transform_3(%arg0: i32) -> (i32, i32) {
    %c0_i32 = arith.constant 0 : i32
    %c0_i32_0 = arith.constant 0 : i32
    %c0_i32_1 = arith.constant 0 : i32
    return %c0_i32, %c0_i32_0 : i32, i32
  }
  func.func @transform_4(%arg0: i32) -> (i32, i32) {
    %c0_i32 = arith.constant 0 : i32
    %c0_i32_0 = arith.constant 0 : i32
    %c0_i32_1 = arith.constant 0 : i32
    return %c0_i32, %c0_i32_0 : i32, i32
  }
  func.func @transform_5(%arg0: i32) -> (i32, i32) {
    %c0_i32 = arith.constant 0 : i32
    %c0_i32_0 = arith.constant 0 : i32
    %c0_i32_1 = arith.constant 0 : i32
    return %c0_i32, %c0_i32_0 : i32, i32
  }
  func.func @transform_6(%arg0: i32) -> (i32, i32) {
    %c0_i32 = arith.constant 0 : i32
    %c0_i32_0 = arith.constant 0 : i32
    %c0_i32_1 = arith.constant 0 : i32
    return %c0_i32, %c0_i32_0 : i32, i32
  }
  func.func @transform_7(%arg0: i32) -> (i32, i32) {
    %c0_i32 = arith.constant 0 : i32
    %c0_i32_0 = arith.constant 0 : i32
    %c0_i32_1 = arith.constant 0 : i32
    return %c0_i32, %c0_i32_0 : i32, i32
  }
  func.func @transform_8(%arg0: i32) -> (i32, i32) {
    %c0_i32 = arith.constant 0 : i32
    %c0_i32_0 = arith.constant 0 : i32
    %c0_i32_1 = arith.constant 0 : i32
    return %c0_i32, %c0_i32_0 : i32, i32
  }
  func.func @transform_9(%arg0: i32) -> (i32, i32) {
    %c0_i32 = arith.constant 0 : i32
    %c0_i32_0 = arith.constant 0 : i32
    return %arg0, %c0_i32 : i32, i32
  }
}

</mosaic_0001>

<bundles_post_ra>
// kernel: tpu_custom_call.1
= control target key start
LH: loop header
LB: loop body
LE: loop exit
PB: predicated region body
PF: predicated region fallthrough
CT: control target
= control target key end

     0   :  { %s376_s0 = inlined_call_operand.vmem [shape: f32[2,3], index: 0, kind: input, shape index: {}]   ;;  %s377_s1 = inlined_call_operand.vmem [shape: f32[2,1], index: 1, kind: input, shape index: {}]   ;;  %s378_s2 = inlined_call_operand.hbm [shape: f32[3,64], index: 2, kind: input, shape index: {}]   ;;  %s379_s3 = inlined_call_operand.vmem [shape: f32[1,64], index: 3, kind: input, shape index: {}]   ;;  %s380_s4 = inlined_call_operand.vmem [shape: f32[1,64], index: 4, kind: input, shape index: {}]   ;;  %s381_s5 = inlined_call_operand.vmem [shape: f32[64,64], index: 5, kind: input, shape index: {}]   ;;  %s382_s6 = inlined_call_operand.vmem [shape: f32[1,64], index: 6, kind: input, shape index: {}]   ;;  %s383_s7 = inlined_call_operand.vmem [shape: f32[64,1], index: 7, kind: input, shape index: {}]   ;;  %s384_s8 = inlined_call_operand.<no memory space> [shape: f32[1,1], index: 8, kind: input, shape index: {}]   ;;  %s385_s9 = inlined_call_operand.vmem [shape: f32[2,1], index: 9, kind: output, shape index: {}]  }
   0x1   :  { %v14_v0 = vstv %s384_s8 }
   0x2   :  { %15 = vst [vmem:[#allocation2] sm:$0x1] %v14_v0 }
   0x3   :  { %16 = vsyncpa [#allocation4], 0  ;;  %s26_s13 = sshll.u32 %s378_s2, 4  ;;  %s250_s14 = smov [#allocation3]   ;;  %s27_s13 = int_to_ptr.hbm [resolvable:$true] %s26_s13 }
   0x4   :  { %s28_s15 = sshll.u32 %s250_s14, 4  ;;  %s29_s15 = int_to_ptr.vmem [resolvable:$true] %s28_s15 }
   0x5   :  { %31 = dma.hbm_to_vmem [thread:$0]  %s27_s13, 64, %s29_s15, [#allocation4]  }
   0x6   :  { %248 = dma.done.wait [#allocation4], 64  }
   0x7   :  { %249 = vsyncadd [#allocation4], 4294967232  ;;  %v251_v1 = vmov 0   ;;  %vm65_vm0 = vcmask 1042432   ;;  %vm61_vm1 = vcmask 23552   ;;  %v48_v3 = vld [vmem:[%s376_s0] sm:$0xff] }
   0x8   :  { %219 = vset.pattern.permute.xlu0 %v251_v1  ;;  %v49_v2 = vld [vmem:[#allocation3] sm:$0x7]  ;;  %v103_v5 = vld [vmem:[%s381_s5 + $0x38] sm:$0xff]  ;;  %v102_v6 = vld [vmem:[%s381_s5 + $0x30] sm:$0xff]  ;;  %vm108_vm2 = vcmask 523264   ;;  %vm169_vm3 = vcmask 7168  }
   0x9   :  { %v50_v4 = vld [vmem:[%s377_s1] sm:$0xff]  ;;  %213 = vmatpush.msk.msra.mxu0 %vm65_vm0, %v49_v2  ;;  %120 = vmatpush.msra.mxu1 %v103_v5  ;;  %v101_v7 = vld [vmem:[%s381_s5 + $0x28] sm:$0xff]  ;;  %v99_v9 = vld [vmem:[%s381_s5 + $0x18] sm:$0xff] }
   0xa   :  { %54 = vperm.xlu0 %219, %v50_v4   ;;  %214 = vmatmul.msk.f32.vlgmr.msra.gmra.mxu0 %vm61_vm1, %v48_v3  ;;  %v100_v8 = vld [vmem:[%s381_s5 + $0x20] sm:$0xff]  ;;  %v98_v10 = vld [vmem:[%s381_s5 + $0x10] sm:$0xff]  ;;  %v97_v11 = vld [vmem:[%s381_s5 + $0x8] sm:$0xff] }
   0xb   :  { %121 = vmatpush.msra.mxu1 %v102_v6  ;;  %v96_v12 = vld [vmem:[%s381_s5] sm:$0xff]  ;;  %v141_v13 = vld [vmem:[%s383_s7 + $0x38] sm:$0xff]  ;;  %v140_v14 = vld [vmem:[%s383_s7 + $0x30] sm:$0xff] }
   0xc   :  { %157 = vmatpush.msra.mxu2 %v141_v13  ;;  %v139_v15 = vld [vmem:[%s383_s7 + $0x28] sm:$0xff]  ;;  %v138_v16 = vld [vmem:[%s383_s7 + $0x20] sm:$0xff]  ;;  %v137_v26 = vld [vmem:[%s383_s7 + $0x18] sm:$0xff] }
   0xd   :  { %122 = vmatpush.msra.mxu1 %v101_v7  ;;  %v220_v17 = vld [vmem:[%s379_s3] ss:$0 sm:$0xff]  ;;  %v136_v27 = vld [vmem:[%s383_s7 + $0x10] sm:$0xff]  ;;  %v135_v28 = vld [vmem:[%s383_s7 + $0x8] sm:$0xff] }
   0xe   :  { %158 = vmatpush.msra.mxu2 %v140_v14  ;;  %v221_v20 = vld [vmem:[%s380_s4] ss:$0 sm:$0xff] }
   0xf   :  { %123 = vmatpush.msra.mxu1 %v100_v8  ;;  %v134_v29 = vld [vmem:[%s383_s7] sm:$0xff] }
  0x10   :  { %159 = vmatpush.msra.mxu2 %v139_v15  ;;  %v222_v30 = vld [vmem:[%s382_s6] ss:$0 sm:$0xff] }
  0x11   :  { %124 = vmatpush.msra.mxu1 %v99_v9  ;;  %v223_v35 = vld [vmem:[#allocation2] ss:$0 sm:$0xff] }
  0x12   :  { %160 = vmatpush.msra.mxu2 %v138_v16 }
  0x13   :  { %125 = vmatpush.msra.mxu1 %v98_v10 }
  0x14   :  { %161 = vmatpush.msra.mxu2 %v137_v26 }
  0x15   :  { %126 = vmatpush.msra.mxu1 %v97_v11 }
  0x16   :  { %162 = vmatpush.msra.mxu2 %v136_v27 }
  0x17   :  { %127 = vmatpush.msra.mxu1 %v96_v12 }
  0x18   :  { %163 = vmatpush.msra.mxu2 %v135_v28 }
  0x1a   :  { %164 = vmatpush.msra.mxu2 %v134_v29 }
  0x7c   :  { %v55_v18 = vpop.permute.xlu0 %54 }
  0x7d   :  { %v60_v19 = vmul.f32 %v220_v17, %v55_v18 }
  0x87   :  { %v86_v21 = vpop.f32.mrf.mxu0 }
  0x88   :  { %v87_v22 = vadd.f32 %v86_v21, %v60_v19 }
  0x8a   :  { %v93_v23 = vadd.f32 %v221_v20, %v87_v22 }
  0x8c   :  { %v94_v24 = vmul.f32 0.01, %v93_v23 }
  0x8e   :  { %v95_v25 = vmax.f32 %v93_v23, %v94_v24 }
  0x90   :  { %215 = vmatmul.msk.f32.vlgmr.msra.gmra.mxu1 %vm108_vm2, %v95_v25 }
 0x10d   :  { %v129_v31 = vpop.f32.mrf.mxu1 }
 0x10e   :  { %v130_v32 = vadd.f32 %v222_v30, %v129_v31 }
 0x110   :  { %v132_v33 = vmul.f32 0.01, %v130_v32 }
 0x112   :  { %v133_v34 = vmax.f32 %v130_v32, %v132_v33 }
 0x114   :  { %216 = vmatmul.msk.f32.vlgmr.msra.gmra.mxu2 %vm108_vm2, %v133_v34 }
 0x197   :  { %v166_v36 = vpop.f32.mrf.mxu2 }
 0x198   :  { %v167_v37 = vadd.f32 %v223_v35, %v166_v36 }
 0x19a   :  { %170 = vst.msk [vmem:[#allocation5] sm:$0xff] %vm169_vm3, %v167_v37 }
 0x1a1   :  { %v189_v38 = vld [vmem:[#allocation5] sm:$0x3] }
 0x1a2   :  { %190 = vst [vmem:[%s385_s9] sm:$0x3] %v189_v38 }
 0x1a3   :  { %208 = vsyncpa [#allocation4], 1 }

</bundles_post_ra>
